<compile_context>
chip_gen: v7x
topology: tpu7x:2x2x1
jax: 0.10.0
libtpu: 0.0.40
codegen_flags: <defaults>
</compile_context>

<pallas_src>
import functools
import math

import jax
import jax.numpy as jnp
from jax.experimental import pallas as pl
from jax.experimental.pallas import tpu as pltpu

_LANE = 128
_AGGR_TILE_ROWS = 4096       # 2 MiB f32 per input tile
_FALLBACK_TILE_ROWS = 2048   # 1 MiB f32 per input tile (previously validated)


def _round_up(x, m):
    return ((x + m - 1) // m) * m


def _num_tensorcores():
    """2 on v7x-class chips (2 TensorCores/chip), 1 on v5e/v6e."""
    try:
        kind = jax.devices()[0].device_kind.lower()
    except Exception:
        return 1
    return 2 if ("v7" in kind or "7x" in kind) else 1


def _metric_loss_kernel(ap_ref, an_ref, out_ref, acc_ref, *,
                        margin, l, tile_rows, steps_per_split,
                        full_rows, rem_cols):
    core = pl.program_id(0)
    step = pl.program_id(1)
    g = core * steps_per_split + step          # intended global block index

    @pl.when(step == 0)
    def _():
        acc_ref[...] = jnp.zeros_like(acc_ref)

    ap = ap_ref[...].astype(jnp.float32)
    an = an_ref[...].astype(jnp.float32)

    one_m_an = 1.0 - an
    e_ap = jnp.exp(1.0 - ap)
    e_an = jnp.exp(one_m_an)
    dis_m = e_ap - e_an + margin
    idx = dis_m > 0.0                          # hard_samples_mining
    # -log(e_an / (e_ap + e_an)) == log(e_ap + e_an) - (1 - an)   (division-free)
    soft = jnp.log(e_ap + e_an) - one_m_an
    # under idx, clamp(dis_m, 0) == dis_m, so no max() needed
    contrib = dis_m + l * soft

    def _accumulate(vals):
        # reduce across sublane groups into the single-vreg accumulator
        acc_ref[...] += jnp.sum(vals.reshape(-1, 8, _LANE), axis=0)

    # only tiles that overlap the padded / out-of-range tail pay for the mask
    needs_mask = (g + 1) * tile_rows > full_rows

    @pl.when(jnp.logical_not(needs_mask))
    def _():
        _accumulate(jnp.where(idx, contrib, 0.0))

    @pl.when(needs_mask)
    def _():
        row0 = g * tile_rows
        r = row0 + jax.lax.broadcasted_iota(jnp.int32, (tile_rows, _LANE), 0)
        c = jax.lax.broadcasted_iota(jnp.int32, (tile_rows, _LANE), 1)
        valid = jnp.logical_or(r < full_rows,
                               jnp.logical_and(r == full_rows, c < rem_cols))
        _accumulate(jnp.where(jnp.logical_and(idx, valid), contrib, 0.0))

    @pl.when(step == steps_per_split - 1)
    def _():
        out_ref[0, 0] = jnp.sum(acc_ref[...])


def _make_launcher(n, dtype, margin, l, aggressive):
    """Build a jitted fn(score_ap, score_an) -> scalar f32 for a fixed config."""
    itemsize = jnp.dtype(dtype).itemsize
    full_rows, rem_cols = divmod(n, _LANE)
    rows = full_rows + (1 if rem_cols else 0)
    rows_p = max(8, _round_up(rows, 8))        # minimal pad: <=1023 elements
    padded_n = rows_p * _LANE

    if aggressive:
        tile_cap, num_splits, fuse = _AGGR_TILE_ROWS, _num_tensorcores(), True
        vmem_limit = 40 * 1024 * 1024
    else:
        tile_cap, num_splits, fuse = _FALLBACK_TILE_ROWS, 1, False
        vmem_limit = None

    tile_rows = min(tile_cap, rows_p)
    num_blocks = pl.cdiv(rows_p, tile_rows)
    num_splits = max(1, min(num_splits, num_blocks))
    steps_per_split = pl.cdiv(num_blocks, num_splits)
    core_parallel = num_splits > 1
    last_block = num_blocks - 1

    kernel = functools.partial(
        _metric_loss_kernel,
        margin=float(margin), l=float(l),
        tile_rows=tile_rows, steps_per_split=steps_per_split,
        full_rows=full_rows, rem_cols=rem_cols)

    def in_map(c, i):
        # clamp so the (at most one) extra split block re-reads the last real
        # block; its contribution is fully masked to zero in the kernel.
        return (jnp.minimum(c * steps_per_split + i, last_block), 0)

    params = dict(
        dimension_semantics=(
            pltpu.CORE_PARALLEL if core_parallel else pltpu.ARBITRARY,
            pltpu.ARBITRARY))
    if vmem_limit is not None:
        params["vmem_limit_bytes"] = int(vmem_limit)
    if fuse:
        params["allow_input_fusion"] = [True, True]

    call = pl.pallas_call(
        kernel,
        out_shape=jax.ShapeDtypeStruct((num_splits, 1), jnp.float32),
        grid_spec=pltpu.PrefetchScalarGridSpec(
            num_scalar_prefetch=0,
            grid=(num_splits, steps_per_split),
            in_specs=[
                pl.BlockSpec((tile_rows, _LANE), in_map),
                pl.BlockSpec((tile_rows, _LANE), in_map),
            ],
            out_specs=pl.BlockSpec((1, 1), lambda c, i: (c, 0),
                                   memory_space=pltpu.SMEM),
            scratch_shapes=[pltpu.VMEM((8, _LANE), jnp.float32)],
        ),
        compiler_params=pltpu.CompilerParams(**params),
        cost_estimate=pl.CostEstimate(
            flops=10 * n, transcendentals=3 * n,
            bytes_accessed=2 * n * itemsize + 8 * num_splits),
    )

    def fn(score_ap, score_an):
        def prep(x):
            x = jnp.ravel(x)
            if padded_n != n:
                x = jnp.pad(x, (0, padded_n - n))   # tiny, fused into the call
            return x.reshape(rows_p, _LANE)
        return jnp.sum(call(prep(score_ap), prep(score_an)))

    return jax.jit(fn)


_LAUNCHER_CACHE = {}


def metric_loss_siamese_1(score_ap, score_an, margin=1.0, l=1.0):
    """Pallas TPU implementation of MetricLoss_Siamese_1.forward -> scalar f32."""
    score_ap = jnp.asarray(score_ap)
    score_an = jnp.asarray(score_an)
    assert score_ap.shape == score_an.shape, "score_ap/score_an shape mismatch"

    n = int(math.prod(score_ap.shape))
    if n == 0:
        return jnp.zeros((), jnp.float32)

    keep = (jnp.dtype(jnp.float32), jnp.dtype(jnp.bfloat16), jnp.dtype(jnp.float16))
    if score_ap.dtype != score_an.dtype or jnp.dtype(score_ap.dtype) not in keep:
        score_ap = score_ap.astype(jnp.float32)
        score_an = score_an.astype(jnp.float32)

    key = (n, str(score_ap.dtype), float(margin), float(l))
    fn = _LAUNCHER_CACHE.get(key)
    if fn is not None:
        return fn(score_ap, score_an)

    primary = _make_launcher(n, score_ap.dtype, margin, l, aggressive=True)
    try:
        out = jax.block_until_ready(primary(score_ap, score_an))
        _LAUNCHER_CACHE[key] = primary
        return out
    except Exception:
        # Conservative fallback (single split, smaller tiles, default VMEM
        # budget, no input fusion) for toolchains/chips that reject the
        # aggressive configuration.
        fallback = _make_launcher(n, score_ap.dtype, margin, l, aggressive=False)
        _LAUNCHER_CACHE[key] = fallback
        return fallback(score_ap, score_an)


def _reference(score_ap, score_an, margin=1.0, l=1.0):
    # pure-JAX reference mirroring the PyTorch code
    score_ap = jnp.asarray(score_ap, jnp.float32)
    score_an = jnp.asarray(score_an, jnp.float32)
    e_ap = jnp.exp(1.0 - score_ap)
    e_an = jnp.exp(1.0 - score_an)
    dis = e_ap - e_an
    idx = (dis + margin) > 0
    trip = jnp.sum(jnp.where(idx, jnp.maximum(dis + margin, 0.0), 0.0))
    soft = jnp.sum(jnp.where(idx, -jnp.log(e_an / (e_an + e_ap)), 0.0))
    return trip + l * soft


if __name__ == "__main__":
    key = jax.random.PRNGKey(0)
    k1, k2, k3, k4, k5, k6 = jax.random.split(key, 6)

    # small, tile-aligned score arrays (8 anchors x 128 scores each)
    ap = jax.random.uniform(k1, (8, 128), jnp.float32, -1.0, 1.0)
    an = jax.random.uniform(k2, (8, 128), jnp.float32, -1.0, 1.0)
    out = jax.block_until_ready(metric_loss_siamese_1(ap, an, margin=1.0, l=1.0))
    ref = _reference(ap, an, 1.0, 1.0)
    assert jnp.allclose(out, ref, rtol=1e-5, atol=1e-3), (out, ref)

    # ragged size (not a multiple of 128 lanes) exercises the masked tail tile
    ap_r = jax.random.uniform(k3, (10, 100), jnp.float32, -1.0, 1.0)
    an_r = jax.random.uniform(k4, (10, 100), jnp.float32, -1.0, 1.0)
    out_r = jax.block_until_ready(metric_loss_siamese_1(ap_r, an_r, margin=0.5, l=0.7))
    ref_r = _reference(ap_r, an_r, 0.5, 0.7)
    assert jnp.allclose(out_r, ref_r, rtol=1e-5, atol=1e-3), (out_r, ref_r)

    # multi-tile case: mask-free steady-state tiles + one masked tail tile
    ap_b = jax.random.uniform(k5, (1200, 1000), jnp.float32, -1.0, 1.0)
    an_b = jax.random.uniform(k6, (1200, 1000), jnp.float32, -1.0, 1.0)
    out_b = jax.block_until_ready(metric_loss_siamese_1(ap_b, an_b, margin=1.0, l=1.0))
    ref_b = _reference(ap_b, an_b, 1.0, 1.0)
    assert jnp.allclose(out_b, ref_b, rtol=2e-3, atol=1.0), (out_b, ref_b)

    # bf16 scores stay bf16 in HBM and are upcast in-kernel
    out_h = jax.block_until_ready(
        metric_loss_siamese_1(ap.astype(jnp.bfloat16), an.astype(jnp.bfloat16)))
    ref_h = _reference(ap.astype(jnp.bfloat16), an.astype(jnp.bfloat16))
    assert jnp.allclose(out_h, ref_h, rtol=1e-4, atol=1e-2), (out_h, ref_h)

    print("KERNEL_OK")
</pallas_src>

<mosaic_0001>
module attributes {stable_mosaic.version = 11 : i64} {
  func.func @_metric_loss_kernel(%arg0: i32, %arg1: i32, %arg2: memref<8x128xf32, #tpu.memory_space<vmem>>, %arg3: memref<8x128xf32, #tpu.memory_space<vmem>>, %arg4: memref<1x1xf32, #tpu.memory_space<smem>>, %arg5: memref<8x128xf32, #tpu.memory_space<vmem>>) attributes {dimension_semantics = [#tpu.dimension_semantics<arbitrary>, #tpu.dimension_semantics<arbitrary>], iteration_bounds = array<i64: 1, 1>, scalar_prefetch = 0 : i64, scratch_operands = 1 : i64, tpu.core_type = #tpu.core_type<tc>, window_params = [{transform_indices = @transform_0, window_bounds = array<i64: 8, 128>}, {transform_indices = @transform_1, window_bounds = array<i64: 8, 128>}, {transform_indices = @transform_2, window_bounds = array<i64: 1, 1>}]} {
    %c1_i32 = arith.constant 1 : i32
    %0 = arith.muli %arg0, %c1_i32 : i32
    %1 = arith.addi %0, %arg1 : i32
    %c0_i32 = arith.constant 0 : i32
    %2 = arith.cmpi eq, %arg1, %c0_i32 : i32
    %3 = arith.extui %2 : i1 to i32
    %c0_i32_0 = arith.constant 0 : i32
    %4 = arith.cmpi ne, %3, %c0_i32_0 : i32
    scf.if %4 {
      %cst_14 = arith.constant 0.000000e+00 : f32
      %35 = vector.broadcast %cst_14 : f32 to vector<8x128xf32>
      %c0_15 = arith.constant 0 : index
      %c0_16 = arith.constant 0 : index
      %36 = vector.load %arg5[%c0_15, %c0_16] : memref<8x128xf32, #tpu.memory_space<vmem>>, vector<8x128xf32>
      tpu.vector_store %arg5[%c0_15, %c0_16], %35 {strides = array<i32>} : memref<8x128xf32, #tpu.memory_space<vmem>>, vector<8x128xf32>,
    } else {
    }
    %c0 = arith.constant 0 : index
    %c0_1 = arith.constant 0 : index
    %5 = vector.load %arg2[%c0, %c0_1] : memref<8x128xf32, #tpu.memory_space<vmem>>, vector<8x128xf32>
    %c0_2 = arith.constant 0 : index
    %c0_3 = arith.constant 0 : index
    %6 = vector.load %arg3[%c0_2, %c0_3] : memref<8x128xf32, #tpu.memory_space<vmem>>, vector<8x128xf32>
    %cst = arith.constant 1.000000e+00 : f32
    %7 = vector.broadcast %cst : f32 to vector<8x128xf32>
    %8 = arith.subf %7, %6 : vector<8x128xf32>
    %cst_4 = arith.constant 1.000000e+00 : f32
    %9 = vector.broadcast %cst_4 : f32 to vector<8x128xf32>
    %10 = arith.subf %9, %5 : vector<8x128xf32>
    %11 = math.exp %10 : vector<8x128xf32>
    %12 = math.exp %8 : vector<8x128xf32>
    %13 = arith.subf %11, %12 : vector<8x128xf32>
    %cst_5 = arith.constant 1.000000e+00 : f32
    %14 = vector.broadcast %cst_5 : f32 to vector<8x128xf32>
    %15 = arith.addf %13, %14 : vector<8x128xf32>
    %cst_6 = arith.constant 0.000000e+00 : f32
    %16 = vector.broadcast %cst_6 : f32 to vector<8x128xf32>
    %17 = arith.cmpf ogt, %15, %16 : vector<8x128xf32>
    %18 = arith.addf %11, %12 : vector<8x128xf32>
    %19 = math.log %18 : vector<8x128xf32>
    %20 = arith.subf %19, %8 : vector<8x128xf32>
    %cst_7 = arith.constant 1.000000e+00 : f32
    %21 = vector.broadcast %cst_7 : f32 to vector<8x128xf32>
    %22 = arith.mulf %21, %20 : vector<8x128xf32>
    %23 = arith.addf %15, %22 : vector<8x128xf32>
    %c1_i32_8 = arith.constant 1 : i32
    %24 = arith.addi %1, %c1_i32_8 : i32
    %c8_i32 = arith.constant 8 : i32
    %25 = arith.muli %24, %c8_i32 : i32
    %c8_i32_9 = arith.constant 8 : i32
    %26 = arith.cmpi sgt, %25, %c8_i32_9 : i32
    %true = arith.constant true
    %27 = arith.xori %26, %true : i1
    %28 = arith.extui %27 : i1 to i32
    %c0_i32_10 = arith.constant 0 : i32
    %29 = arith.cmpi ne, %28, %c0_i32_10 : i32
    scf.if %29 {
      %cst_14 = arith.constant 0.000000e+00 : f32
      %35 = vector.broadcast %cst_14 : f32 to vector<8x128xf32>
      %36 = arith.select %17, %23, %35 : vector<8x128xi1>, vector<8x128xf32>
      %c0_15 = arith.constant 0 : index
      %c0_16 = arith.constant 0 : index
      %37 = vector.load %arg5[%c0_15, %c0_16] : memref<8x128xf32, #tpu.memory_space<vmem>>, vector<8x128xf32>
      %38 = vector.shape_cast %36 : vector<8x128xf32> to vector<1x8x128xf32>
      %cst_17 = arith.constant dense<0.000000e+00> : vector<8x128xf32>
      %39 = vector.multi_reduction <add>, %38, %cst_17 [0] : vector<1x8x128xf32> to vector<8x128xf32>
      %40 = arith.addf %37, %39 : vector<8x128xf32>
      %c0_18 = arith.constant 0 : index
      %c0_19 = arith.constant 0 : index
      %41 = vector.load %arg5[%c0_18, %c0_19] : memref<8x128xf32, #tpu.memory_space<vmem>>, vector<8x128xf32>
      tpu.vector_store %arg5[%c0_18, %c0_19], %40 {strides = array<i32>} : memref<8x128xf32, #tpu.memory_space<vmem>>, vector<8x128xf32>,
    } else {
    }
    %30 = arith.extui %26 : i1 to i32
    %c0_i32_11 = arith.constant 0 : i32
    %31 = arith.cmpi ne, %30, %c0_i32_11 : i32
    scf.if %31 {
      %c8_i32_14 = arith.constant 8 : i32
      %35 = arith.muli %1, %c8_i32_14 : i32
      %36 = tpu.iota {dimensions = array<i32: 0>} : vector<8x128xi32>
      %37 = vector.broadcast %35 : i32 to vector<8x128xi32>
      %38 = arith.addi %37, %36 : vector<8x128xi32>
      %39 = tpu.iota {dimensions = array<i32: 1>} : vector<8x128xi32>
      %c8_i32_15 = arith.constant 8 : i32
      %40 = vector.broadcast %c8_i32_15 : i32 to vector<8x128xi32>
      %41 = arith.cmpi slt, %38, %40 : vector<8x128xi32>
      %c8_i32_16 = arith.constant 8 : i32
      %42 = vector.broadcast %c8_i32_16 : i32 to vector<8x128xi32>
      %43 = arith.cmpi eq, %38, %42 : vector<8x128xi32>
      %c0_i32_17 = arith.constant 0 : i32
      %44 = vector.broadcast %c0_i32_17 : i32 to vector<8x128xi32>
      %45 = arith.cmpi slt, %39, %44 : vector<8x128xi32>
      %46 = arith.andi %43, %45 : vector<8x128xi1>
      %47 = arith.ori %41, %46 : vector<8x128xi1>
      %48 = arith.andi %17, %47 : vector<8x128xi1>
      %cst_18 = arith.constant 0.000000e+00 : f32
      %49 = vector.broadcast %cst_18 : f32 to vector<8x128xf32>
      %50 = arith.select %48, %23, %49 : vector<8x128xi1>, vector<8x128xf32>
      %c0_19 = arith.constant 0 : index
      %c0_20 = arith.constant 0 : index
      %51 = vector.load %arg5[%c0_19, %c0_20] : memref<8x128xf32, #tpu.memory_space<vmem>>, vector<8x128xf32>
      %52 = vector.shape_cast %50 : vector<8x128xf32> to vector<1x8x128xf32>
      %cst_21 = arith.constant dense<0.000000e+00> : vector<8x128xf32>
      %53 = vector.multi_reduction <add>, %52, %cst_21 [0] : vector<1x8x128xf32> to vector<8x128xf32>
      %54 = arith.addf %51, %53 : vector<8x128xf32>
      %c0_22 = arith.constant 0 : index
      %c0_23 = arith.constant 0 : index
      %55 = vector.load %arg5[%c0_22, %c0_23] : memref<8x128xf32, #tpu.memory_space<vmem>>, vector<8x128xf32>
      tpu.vector_store %arg5[%c0_22, %c0_23], %54 {strides = array<i32>} : memref<8x128xf32, #tpu.memory_space<vmem>>, vector<8x128xf32>,
    } else {
    }
    %c0_i32_12 = arith.constant 0 : i32
    %32 = arith.cmpi eq, %arg1, %c0_i32_12 : i32
    %33 = arith.extui %32 : i1 to i32
    %c0_i32_13 = arith.constant 0 : i32
    %34 = arith.cmpi ne, %33, %c0_i32_13 : i32
    scf.if %34 {
      %c0_14 = arith.constant 0 : index
      %c0_15 = arith.constant 0 : index
      %35 = vector.load %arg5[%c0_14, %c0_15] : memref<8x128xf32, #tpu.memory_space<vmem>>, vector<8x128xf32>
      %36 = vector.shape_cast %35 : vector<8x128xf32> to vector<1x8x128xf32>
      %cst_16 = arith.constant dense<0.000000e+00> : vector<1xf32>
      %37 = vector.multi_reduction <add>, %36, %cst_16 [1, 2] : vector<1x8x128xf32> to vector<1xf32>
      %38 = vector.shape_cast %37 : vector<1xf32> to vector<1x1x1xf32>
      %39 = vector.extract %38[0, 0, 0] : f32 from vector<1x1x1xf32>
      %c0_17 = arith.constant 0 : index
      %c0_18 = arith.constant 0 : index
      %40 = memref.load %arg4[%c0_17, %c0_18] : memref<1x1xf32, #tpu.memory_space<smem>>
      memref.store %39, %arg4[%c0_17, %c0_18] : memref<1x1xf32, #tpu.memory_space<smem>>
    } else {
    }
    return
  }
  func.func @transform_0(%arg0: i32, %arg1: i32) -> (i32, i32) {
    %c1_i32 = arith.constant 1 : i32
    %0 = arith.muli %arg0, %c1_i32 : i32
    %1 = arith.addi %0, %arg1 : i32
    %c0_i32 = arith.constant 0 : i32
    %2 = arith.minsi %1, %c0_i32 : i32
    %c0_i32_0 = arith.constant 0 : i32
    %c0_i32_1 = arith.constant 0 : i32
    return %2, %c0_i32_0 : i32, i32
  }
  func.func @transform_1(%arg0: i32, %arg1: i32) -> (i32, i32) {
    %c1_i32 = arith.constant 1 : i32
    %0 = arith.muli %arg0, %c1_i32 : i32
    %1 = arith.addi %0, %arg1 : i32
    %c0_i32 = arith.constant 0 : i32
    %2 = arith.minsi %1, %c0_i32 : i32
    %c0_i32_0 = arith.constant 0 : i32
    %c0_i32_1 = arith.constant 0 : i32
    return %2, %c0_i32_0 : i32, i32
  }
  func.func @transform_2(%arg0: i32, %arg1: i32) -> (i32, i32) {
    %c0_i32 = arith.constant 0 : i32
    %c0_i32_0 = arith.constant 0 : i32
    return %arg0, %c0_i32 : i32, i32
  }
}

module attributes {stable_mosaic.version = 11 : i64} {
  func.func @_metric_loss_kernel(%arg0: i32, %arg1: i32, %arg2: memref<8x128xf32, #tpu.memory_space<vmem>>, %arg3: memref<8x128xf32, #tpu.memory_space<vmem>>, %arg4: memref<1x1xf32, #tpu.memory_space<smem>>, %arg5: memref<8x128xf32, #tpu.memory_space<vmem>>) attributes {dimension_semantics = [#tpu.dimension_semantics<arbitrary>, #tpu.dimension_semantics<arbitrary>], iteration_bounds = array<i64: 1, 1>, scalar_prefetch = 0 : i64, scratch_operands = 1 : i64, tpu.core_type = #tpu.core_type<tc>, window_params = [{transform_indices = @transform_0, window_bounds = array<i64: 8, 128>}, {transform_indices = @transform_1, window_bounds = array<i64: 8, 128>}, {transform_indices = @transform_2, window_bounds = array<i64: 1, 1>}]} {
    %c1_i32 = arith.constant 1 : i32
    %0 = arith.muli %arg0, %c1_i32 : i32
    %1 = arith.addi %0, %arg1 : i32
    %c0_i32 = arith.constant 0 : i32
    %2 = arith.cmpi eq, %arg1, %c0_i32 : i32
    %3 = arith.extui %2 : i1 to i32
    %c0_i32_0 = arith.constant 0 : i32
    %4 = arith.cmpi ne, %3, %c0_i32_0 : i32
    scf.if %4 {
      %cst_14 = arith.constant 0.000000e+00 : f32
      %35 = vector.broadcast %cst_14 : f32 to vector<8x128xf32>
      %c0_15 = arith.constant 0 : index
      %c0_16 = arith.constant 0 : index
      %36 = vector.load %arg5[%c0_15, %c0_16] : memref<8x128xf32, #tpu.memory_space<vmem>>, vector<8x128xf32>
      tpu.vector_store %arg5[%c0_15, %c0_16], %35 {strides = array<i32>} : memref<8x128xf32, #tpu.memory_space<vmem>>, vector<8x128xf32>,
    } else {
    }
    %c0 = arith.constant 0 : index
    %c0_1 = arith.constant 0 : index
    %5 = vector.load %arg2[%c0, %c0_1] : memref<8x128xf32, #tpu.memory_space<vmem>>, vector<8x128xf32>
    %c0_2 = arith.constant 0 : index
    %c0_3 = arith.constant 0 : index
    %6 = vector.load %arg3[%c0_2, %c0_3] : memref<8x128xf32, #tpu.memory_space<vmem>>, vector<8x128xf32>
    %cst = arith.constant 1.000000e+00 : f32
    %7 = vector.broadcast %cst : f32 to vector<8x128xf32>
    %8 = arith.subf %7, %6 : vector<8x128xf32>
    %cst_4 = arith.constant 1.000000e+00 : f32
    %9 = vector.broadcast %cst_4 : f32 to vector<8x128xf32>
    %10 = arith.subf %9, %5 : vector<8x128xf32>
    %11 = math.exp %10 : vector<8x128xf32>
    %12 = math.exp %8 : vector<8x128xf32>
    %13 = arith.subf %11, %12 : vector<8x128xf32>
    %cst_5 = arith.constant 1.000000e+00 : f32
    %14 = vector.broadcast %cst_5 : f32 to vector<8x128xf32>
    %15 = arith.addf %13, %14 : vector<8x128xf32>
    %cst_6 = arith.constant 0.000000e+00 : f32
    %16 = vector.broadcast %cst_6 : f32 to vector<8x128xf32>
    %17 = arith.cmpf ogt, %15, %16 : vector<8x128xf32>
    %18 = arith.addf %11, %12 : vector<8x128xf32>
    %19 = math.log %18 : vector<8x128xf32>
    %20 = arith.subf %19, %8 : vector<8x128xf32>
    %cst_7 = arith.constant 1.000000e+00 : f32
    %21 = vector.broadcast %cst_7 : f32 to vector<8x128xf32>
    %22 = arith.mulf %21, %20 : vector<8x128xf32>
    %23 = arith.addf %15, %22 : vector<8x128xf32>
    %c1_i32_8 = arith.constant 1 : i32
    %24 = arith.addi %1, %c1_i32_8 : i32
    %c8_i32 = arith.constant 8 : i32
    %25 = arith.muli %24, %c8_i32 : i32
    %c8_i32_9 = arith.constant 8 : i32
    %26 = arith.cmpi sgt, %25, %c8_i32_9 : i32
    %true = arith.constant true
    %27 = arith.xori %26, %true : i1
    %28 = arith.extui %27 : i1 to i32
    %c0_i32_10 = arith.constant 0 : i32
    %29 = arith.cmpi ne, %28, %c0_i32_10 : i32
    scf.if %29 {
      %cst_14 = arith.constant 0.000000e+00 : f32
      %35 = vector.broadcast %cst_14 : f32 to vector<8x128xf32>
      %36 = arith.select %17, %23, %35 : vector<8x128xi1>, vector<8x128xf32>
      %c0_15 = arith.constant 0 : index
      %c0_16 = arith.constant 0 : index
      %37 = vector.load %arg5[%c0_15, %c0_16] : memref<8x128xf32, #tpu.memory_space<vmem>>, vector<8x128xf32>
      %38 = vector.shape_cast %36 : vector<8x128xf32> to vector<1x8x128xf32>
      %cst_17 = arith.constant dense<0.000000e+00> : vector<8x128xf32>
      %39 = vector.multi_reduction <add>, %38, %cst_17 [0] : vector<1x8x128xf32> to vector<8x128xf32>
      %40 = arith.addf %37, %39 : vector<8x128xf32>
      %c0_18 = arith.constant 0 : index
      %c0_19 = arith.constant 0 : index
      %41 = vector.load %arg5[%c0_18, %c0_19] : memref<8x128xf32, #tpu.memory_space<vmem>>, vector<8x128xf32>
      tpu.vector_store %arg5[%c0_18, %c0_19], %40 {strides = array<i32>} : memref<8x128xf32, #tpu.memory_space<vmem>>, vector<8x128xf32>,
    } else {
    }
    %30 = arith.extui %26 : i1 to i32
    %c0_i32_11 = arith.constant 0 : i32
    %31 = arith.cmpi ne, %30, %c0_i32_11 : i32
    scf.if %31 {
      %c8_i32_14 = arith.constant 8 : i32
      %35 = arith.muli %1, %c8_i32_14 : i32
      %36 = tpu.iota {dimensions = array<i32: 0>} : vector<8x128xi32>
      %37 = vector.broadcast %35 : i32 to vector<8x128xi32>
      %38 = arith.addi %37, %36 : vector<8x128xi32>
      %39 = tpu.iota {dimensions = array<i32: 1>} : vector<8x128xi32>
      %c8_i32_15 = arith.constant 8 : i32
      %40 = vector.broadcast %c8_i32_15 : i32 to vector<8x128xi32>
      %41 = arith.cmpi slt, %38, %40 : vector<8x128xi32>
      %c8_i32_16 = arith.constant 8 : i32
      %42 = vector.broadcast %c8_i32_16 : i32 to vector<8x128xi32>
      %43 = arith.cmpi eq, %38, %42 : vector<8x128xi32>
      %c0_i32_17 = arith.constant 0 : i32
      %44 = vector.broadcast %c0_i32_17 : i32 to vector<8x128xi32>
      %45 = arith.cmpi slt, %39, %44 : vector<8x128xi32>
      %46 = arith.andi %43, %45 : vector<8x128xi1>
      %47 = arith.ori %41, %46 : vector<8x128xi1>
      %48 = arith.andi %17, %47 : vector<8x128xi1>
      %cst_18 = arith.constant 0.000000e+00 : f32
      %49 = vector.broadcast %cst_18 : f32 to vector<8x128xf32>
      %50 = arith.select %48, %23, %49 : vector<8x128xi1>, vector<8x128xf32>
      %c0_19 = arith.constant 0 : index
      %c0_20 = arith.constant 0 : index
      %51 = vector.load %arg5[%c0_19, %c0_20] : memref<8x128xf32, #tpu.memory_space<vmem>>, vector<8x128xf32>
      %52 = vector.shape_cast %50 : vector<8x128xf32> to vector<1x8x128xf32>
      %cst_21 = arith.constant dense<0.000000e+00> : vector<8x128xf32>
      %53 = vector.multi_reduction <add>, %52, %cst_21 [0] : vector<1x8x128xf32> to vector<8x128xf32>
      %54 = arith.addf %51, %53 : vector<8x128xf32>
      %c0_22 = arith.constant 0 : index
      %c0_23 = arith.constant 0 : index
      %55 = vector.load %arg5[%c0_22, %c0_23] : memref<8x128xf32, #tpu.memory_space<vmem>>, vector<8x128xf32>
      tpu.vector_store %arg5[%c0_22, %c0_23], %54 {strides = array<i32>} : memref<8x128xf32, #tpu.memory_space<vmem>>, vector<8x128xf32>,
    } else {
    }
    %c0_i32_12 = arith.constant 0 : i32
    %32 = arith.cmpi eq, %arg1, %c0_i32_12 : i32
    %33 = arith.extui %32 : i1 to i32
    %c0_i32_13 = arith.constant 0 : i32
    %34 = arith.cmpi ne, %33, %c0_i32_13 : i32
    scf.if %34 {
      %c0_14 = arith.constant 0 : index
      %c0_15 = arith.constant 0 : index
      %35 = vector.load %arg5[%c0_14, %c0_15] : memref<8x128xf32, #tpu.memory_space<vmem>>, vector<8x128xf32>
      %36 = vector.shape_cast %35 : vector<8x128xf32> to vector<1x8x128xf32>
      %cst_16 = arith.constant dense<0.000000e+00> : vector<1xf32>
      %37 = vector.multi_reduction <add>, %36, %cst_16 [1, 2] : vector<1x8x128xf32> to vector<1xf32>
      %38 = vector.shape_cast %37 : vector<1xf32> to vector<1x1x1xf32>
      %39 = vector.extract %38[0, 0, 0] : f32 from vector<1x1x1xf32>
      %c0_17 = arith.constant 0 : index
      %c0_18 = arith.constant 0 : index
      %40 = memref.load %arg4[%c0_17, %c0_18] : memref<1x1xf32, #tpu.memory_space<smem>>
      memref.store %39, %arg4[%c0_17, %c0_18] : memref<1x1xf32, #tpu.memory_space<smem>>
    } else {
    }
    return
  }
  func.func @transform_0(%arg0: i32, %arg1: i32) -> (i32, i32) {
    %c1_i32 = arith.constant 1 : i32
    %0 = arith.muli %arg0, %c1_i32 : i32
    %1 = arith.addi %0, %arg1 : i32
    %c0_i32 = arith.constant 0 : i32
    %2 = arith.minsi %1, %c0_i32 : i32
    %c0_i32_0 = arith.constant 0 : i32
    %c0_i32_1 = arith.constant 0 : i32
    return %2, %c0_i32_0 : i32, i32
  }
  func.func @transform_1(%arg0: i32, %arg1: i32) -> (i32, i32) {
    %c1_i32 = arith.constant 1 : i32
    %0 = arith.muli %arg0, %c1_i32 : i32
    %1 = arith.addi %0, %arg1 : i32
    %c0_i32 = arith.constant 0 : i32
    %2 = arith.minsi %1, %c0_i32 : i32
    %c0_i32_0 = arith.constant 0 : i32
    %c0_i32_1 = arith.constant 0 : i32
    return %2, %c0_i32_0 : i32, i32
  }
  func.func @transform_2(%arg0: i32, %arg1: i32) -> (i32, i32) {
    %c0_i32 = arith.constant 0 : i32
    %c0_i32_0 = arith.constant 0 : i32
    return %arg0, %c0_i32 : i32, i32
  }
}

</mosaic_0001>

<bundles_post_ra>
// kernel: fn.1
= control target key start
LH: loop header
LB: loop body
LE: loop exit
PB: predicated region body
PF: predicated region fallthrough
CT: control target
= control target key end

     0   :  { %7 = vsyncpa [#allocation4], 0  ;;  %s266_s0 = inlined_call_operand.hbm [shape: f32[8,128], index: 0, kind: input, shape index: {}]   ;;  %s267_s1 = inlined_call_operand.hbm [shape: f32[8,128], index: 1, kind: input, shape index: {}]   ;;  %s268_s2 = inlined_call_operand.hbm [shape: f32[1,1], index: 2, kind: output, shape index: {}]  }
   0x1   :  { %8 = vsyncpa [#allocation7], 0 }
   0x2   :  { %9 = vsyncpa [#allocation5], 0  ;;  %s212_s9 = smov [#allocation3]   ;;  %s213_s11 = smov [#allocation6]  }
   0x3   :  { %s21_s10 = sshll.u32 %s212_s9, 4  ;;  %s36_s12 = sshll.u32 %s213_s11, 4  ;;  %s22_s10 = int_to_ptr.vmem [resolvable:$true] %s21_s10  ;;  %s37_s12 = int_to_ptr.vmem [resolvable:$true] %s36_s12 }
   0x4   :  { %s152_s15 = scalar_lea.hbm %s266_s0, 128 }
   0x5   :  { %p153_p0 = scmp.ne.s32.totalorder %s266_s0, %s152_s15  ;;  %p156_p1 = scmp.lt.u32.totalorder %s152_s15, %s266_s0 }
   0x7   :  { %p158_p2 = pnand %p156_p1, %p153_p0 }
   0x9   :  { %161 = shalt.err (!%p158_p2)
}
   0xa   :  { %s162_s20 = scalar_lea.vmem %s22_s10, 128  ;;  %p167_p4 = scmp.lt.s32.totalorder %s22_s10, %s22_s10 }
   0xb   :  { %p163_p3 = scmp.ne.s32.totalorder %s22_s10, %s162_s20  ;;  %p168_p5 = scmp.lt.s32.totalorder %s162_s20, %s162_s20 }
   0xd   :  { %p169_p6 = por %p168_p5, %p167_p4 }
   0xf   :  { %p170_p7 = pnand %p169_p6, %p163_p3 }
  0x11   :  { %173 = shalt.err (!%p170_p7)
}
  0x12   :  { %24 = dma.hbm_to_vmem [thread:$0]  %s266_s0, 128, %s22_s10, [#allocation4]  }
  0x13   :  { %s174_s25 = scalar_lea.hbm %s267_s1, 128 }
  0x14   :  { %p175_p8 = scmp.ne.s32.totalorder %s267_s1, %s174_s25  ;;  %p178_p9 = scmp.lt.u32.totalorder %s174_s25, %s267_s1 }
  0x16   :  { %p180_p10 = pnand %p178_p9, %p175_p8 }
  0x18   :  { %183 = shalt.err (!%p180_p10)
}
  0x19   :  { %s184_s30 = scalar_lea.vmem %s37_s12, 128  ;;  %p189_p12 = scmp.lt.s32.totalorder %s37_s12, %s37_s12 }
  0x1a   :  { %p185_p11 = scmp.ne.s32.totalorder %s37_s12, %s184_s30  ;;  %p190_p13 = scmp.lt.s32.totalorder %s184_s30, %s184_s30 }
  0x1c   :  { %p191_p0 = por %p190_p13, %p189_p12 }
  0x1e   :  { %p192_p1 = pnand %p191_p0, %p185_p11 }
  0x20   :  { %195 = shalt.err (!%p192_p1)
}
  0x21   :  { %39 = dma.hbm_to_vmem [thread:$0]  %s267_s1, 128, %s37_s12, [#allocation7]  }
  0x22   :  { %206 = dma.done.wait [#allocation4], 128  }
  0x23   :  { %207 = vsyncadd [#allocation4], 4294967168 }
  0x24   :  { %208 = dma.done.wait [#allocation7], 128  }
  0x25   :  { %209 = vsyncadd [#allocation7], 4294967168  ;;  %v58_v0 = vld [vmem:[#allocation3] sm:$0xff]  ;;  %v59_v1 = vld [vmem:[#allocation6] sm:$0xff]  ;;  %s196_s6 = scalar_lea.hbm %s268_s2, 16 }
  0x26   :  { %v60_v2 = vsub.f32 1.0, %v59_v1  ;;  %v61_v3 = vsub.f32 1.0, %v58_v0  ;;  %p197_p2 = scmp.ne.s32.totalorder %s268_s2, %s196_s6  ;;  %p200_p3 = scmp.lt.u32.totalorder %s196_s6, %s268_s2 }
  0x28   :  { %v62_v4 = vmul.f32 1.442695, %v61_v3  ;;  %v64_v5 = vmul.f32 1.442695, %v60_v2  ;;  %p202_p4 = pnand %p200_p3, %p197_p2 }
  0x2a   :  { %146 = vpow2.f32 %v62_v4 }
  0x2b   :  { %148 = vpow2.f32 %v64_v5 }
  0x34   :  { %v147_v6 = vpop.eup %146 }
  0x35   :  { %v149_v7 = vpop.eup %148 }
  0x36   :  { %v69_v8 = vadd.f32 %v149_v7, %v147_v6  ;;  %v66_v9 = vsub.f32 %v147_v6, %v149_v7 }
  0x38   :  { %150 = vlog2.f32 %v69_v8  ;;  %v67_v11 = vadd.f32 1.0, %v66_v9 }
  0x3a   :  { %vm68_vm0 = vcmp.gt.f32.partialorder %v67_v11, 0.0 }
  0x42   :  { %v151_v10 = vpop.eup %150 }
  0x43   :  { %v71_v12 = vmul.f32 0.6931472, %v151_v10 }
  0x45   :  { %v72_v13 = vsub.f32 %v71_v12, %v60_v2 }
  0x47   :  { %v73_v14 = vadd.f32 %v72_v13, %v67_v11 }
  0x49   :  { %v81_v15 = vsel %vm68_vm0, %v73_v14, 0.0 }
  0x4a   :  { %111 = vadd.xlane.f32.xlu0 %v81_v15 }
  0xd7   :  { %v112_v16 = vpop.xlane.xlu0 %111 }
  0xd8   :  { %v113_v17 = vrot.slane %v112_v16, 4 }
  0xda   :  { %v114_v18 = vadd.f32 %v113_v17, %v112_v16 }
  0xdc   :  { %v115_v19 = vrot.slane %v114_v18, 2 }
  0xde   :  { %v116_v20 = vadd.f32 %v115_v19, %v114_v18 }
  0xe0   :  { %v117_v21 = vrot.slane %v116_v20, 1 }
  0xe2   :  { %v118_v22 = vadd.f32 %v117_v21, %v116_v20 }
  0xe4   :  { %141 = vpush %v118_v22 }
 0x115   :  { %s142_s1 = spop %141 }
 0x116   :  { %121 = sst [smem:[#allocation8]] %s142_s1 }
 0x117   :  { %205 = shalt.err (!%p202_p4)
}
 0x118   :  { %s214_s11 = smov [#allocation8]  }
 0x119   :  { %129 = dma.smem_to_hbm %s214_s11, 16, %s268_s2, [#allocation5]  }
 0x11a   :  { %210 = dma.done.wait [#allocation5], 16  }
 0x11b   :  { %211 = vsyncadd [#allocation5], 4294967280 }
 0x11c   :  { %133 = sfence }
 0x11d   :  { %134 = vsyncpa [#allocation4], 1 }
 0x11e   :  { %135 = vsyncpa [#allocation7], 1 }
 0x11f   :  { %136 = vsyncpa [#allocation5], 1 }

// kernel: fn.1
= control target key start
LH: loop header
LB: loop body
LE: loop exit
PB: predicated region body
PF: predicated region fallthrough
CT: control target
= control target key end

     0   :  { %7 = vsyncpa [#allocation4], 0  ;;  %s266_s0 = inlined_call_operand.hbm [shape: f32[8,128], index: 0, kind: input, shape index: {}]   ;;  %s267_s1 = inlined_call_operand.hbm [shape: f32[8,128], index: 1, kind: input, shape index: {}]   ;;  %s268_s2 = inlined_call_operand.hbm [shape: f32[1,1], index: 2, kind: output, shape index: {}]  }
   0x1   :  { %8 = vsyncpa [#allocation7], 0 }
   0x2   :  { %9 = vsyncpa [#allocation5], 0  ;;  %s212_s9 = smov [#allocation3]   ;;  %s213_s11 = smov [#allocation6]  }
   0x3   :  { %s21_s10 = sshll.u32 %s212_s9, 4  ;;  %s36_s12 = sshll.u32 %s213_s11, 4  ;;  %s22_s10 = int_to_ptr.vmem [resolvable:$true] %s21_s10  ;;  %s37_s12 = int_to_ptr.vmem [resolvable:$true] %s36_s12 }
   0x4   :  { %s152_s15 = scalar_lea.hbm %s266_s0, 128 }
   0x5   :  { %p153_p0 = scmp.ne.s32.totalorder %s266_s0, %s152_s15  ;;  %p156_p1 = scmp.lt.u32.totalorder %s152_s15, %s266_s0 }
   0x7   :  { %p158_p2 = pnand %p156_p1, %p153_p0 }
   0x9   :  { %161 = shalt.err (!%p158_p2)
}
   0xa   :  { %s162_s20 = scalar_lea.vmem %s22_s10, 128  ;;  %p167_p4 = scmp.lt.s32.totalorder %s22_s10, %s22_s10 }
   0xb   :  { %p163_p3 = scmp.ne.s32.totalorder %s22_s10, %s162_s20  ;;  %p168_p5 = scmp.lt.s32.totalorder %s162_s20, %s162_s20 }
   0xd   :  { %p169_p6 = por %p168_p5, %p167_p4 }
   0xf   :  { %p170_p7 = pnand %p169_p6, %p163_p3 }
  0x11   :  { %173 = shalt.err (!%p170_p7)
}
  0x12   :  { %24 = dma.hbm_to_vmem [thread:$0]  %s266_s0, 128, %s22_s10, [#allocation4]  }
  0x13   :  { %s174_s25 = scalar_lea.hbm %s267_s1, 128 }
  0x14   :  { %p175_p8 = scmp.ne.s32.totalorder %s267_s1, %s174_s25  ;;  %p178_p9 = scmp.lt.u32.totalorder %s174_s25, %s267_s1 }
  0x16   :  { %p180_p10 = pnand %p178_p9, %p175_p8 }
  0x18   :  { %183 = shalt.err (!%p180_p10)
}
  0x19   :  { %s184_s30 = scalar_lea.vmem %s37_s12, 128  ;;  %p189_p12 = scmp.lt.s32.totalorder %s37_s12, %s37_s12 }
  0x1a   :  { %p185_p11 = scmp.ne.s32.totalorder %s37_s12, %s184_s30  ;;  %p190_p13 = scmp.lt.s32.totalorder %s184_s30, %s184_s30 }
  0x1c   :  { %p191_p0 = por %p190_p13, %p189_p12 }
  0x1e   :  { %p192_p1 = pnand %p191_p0, %p185_p11 }
  0x20   :  { %195 = shalt.err (!%p192_p1)
}
  0x21   :  { %39 = dma.hbm_to_vmem [thread:$0]  %s267_s1, 128, %s37_s12, [#allocation7]  }
  0x22   :  { %206 = dma.done.wait [#allocation4], 128  }
  0x23   :  { %207 = vsyncadd [#allocation4], 4294967168 }
  0x24   :  { %208 = dma.done.wait [#allocation7], 128  }
  0x25   :  { %209 = vsyncadd [#allocation7], 4294967168  ;;  %v58_v0 = vld [vmem:[#allocation3] sm:$0xff]  ;;  %v59_v1 = vld [vmem:[#allocation6] sm:$0xff]  ;;  %s196_s6 = scalar_lea.hbm %s268_s2, 16 }
  0x26   :  { %v60_v2 = vsub.f32 1.0, %v59_v1  ;;  %v61_v3 = vsub.f32 1.0, %v58_v0  ;;  %p197_p2 = scmp.ne.s32.totalorder %s268_s2, %s196_s6  ;;  %p200_p3 = scmp.lt.u32.totalorder %s196_s6, %s268_s2 }
  0x28   :  { %v62_v4 = vmul.f32 1.442695, %v61_v3  ;;  %v64_v5 = vmul.f32 1.442695, %v60_v2  ;;  %p202_p4 = pnand %p200_p3, %p197_p2 }
  0x2a   :  { %146 = vpow2.f32 %v62_v4 }
  0x2b   :  { %148 = vpow2.f32 %v64_v5 }
  0x34   :  { %v147_v6 = vpop.eup %146 }
  0x35   :  { %v149_v7 = vpop.eup %148 }
  0x36   :  { %v69_v8 = vadd.f32 %v149_v7, %v147_v6  ;;  %v66_v9 = vsub.f32 %v147_v6, %v149_v7 }
  0x38   :  { %150 = vlog2.f32 %v69_v8  ;;  %v67_v11 = vadd.f32 1.0, %v66_v9 }
  0x3a   :  { %vm68_vm0 = vcmp.gt.f32.partialorder %v67_v11, 0.0 }
  0x42   :  { %v151_v10 = vpop.eup %150 }
  0x43   :  { %v71_v12 = vmul.f32 0.6931472, %v151_v10 }
  0x45   :  { %v72_v13 = vsub.f32 %v71_v12, %v60_v2 }
  0x47   :  { %v73_v14 = vadd.f32 %v72_v13, %v67_v11 }
  0x49   :  { %v81_v15 = vsel %vm68_vm0, %v73_v14, 0.0 }
  0x4a   :  { %111 = vadd.xlane.f32.xlu0 %v81_v15 }
  0xd7   :  { %v112_v16 = vpop.xlane.xlu0 %111 }
  0xd8   :  { %v113_v17 = vrot.slane %v112_v16, 4 }
  0xda   :  { %v114_v18 = vadd.f32 %v113_v17, %v112_v16 }
  0xdc   :  { %v115_v19 = vrot.slane %v114_v18, 2 }
  0xde   :  { %v116_v20 = vadd.f32 %v115_v19, %v114_v18 }
  0xe0   :  { %v117_v21 = vrot.slane %v116_v20, 1 }
  0xe2   :  { %v118_v22 = vadd.f32 %v117_v21, %v116_v20 }
  0xe4   :  { %141 = vpush %v118_v22 }
 0x115   :  { %s142_s1 = spop %141 }
 0x116   :  { %121 = sst [smem:[#allocation8]] %s142_s1 }
 0x117   :  { %205 = shalt.err (!%p202_p4)
}
 0x118   :  { %s214_s11 = smov [#allocation8]  }
 0x119   :  { %129 = dma.smem_to_hbm %s214_s11, 16, %s268_s2, [#allocation5]  }
 0x11a   :  { %210 = dma.done.wait [#allocation5], 16  }
 0x11b   :  { %211 = vsyncadd [#allocation5], 4294967280 }
 0x11c   :  { %133 = sfence }
 0x11d   :  { %134 = vsyncpa [#allocation4], 1 }
 0x11e   :  { %135 = vsyncpa [#allocation7], 1 }
 0x11f   :  { %136 = vsyncpa [#allocation5], 1 }

</bundles_post_ra>
